<compile_context>
chip_gen: v5e
topology: v5e:2x2
jax: 0.10.0
libtpu: 0.0.40
codegen_flags: <defaults>
</compile_context>

<pallas_src>
import functools

import jax
import jax.numpy as jnp
from jax import lax
from jax.experimental import pallas as pl
from jax.experimental.pallas import tpu as pltpu


def _mha_kernel(x_ref, w_all_ref, w_fc_t_ref, o_ref, *, n_heads, feature_dim):
    """Single invocation (grid=()): all batches, all heads fused in-kernel.

    x_ref      : (B, N, F)  f32   input (fully VMEM-resident)
    w_all_ref  : (F, H*F)   bf16  concatenated head projection weights
    w_fc_t_ref : (H*F, F)   bf16  fc weight, pre-transposed in the wrapper
    o_ref      : (B, N, F)  f32   output
    """
    F = feature_dim
    B, N, _ = x_ref.shape
    BN = B * N

    # Weights loaded once (bf16, tiny).
    w_all = w_all_ref[...]                                               # (F, H*F)
    w_fc_t = w_fc_t_ref[...]                                             # (H*F, F)

    # Flatten batch for the shared projection: (B*N, F) doubles MXU row occupancy.
    x2d = x_ref[...].reshape(BN, F)

    # Fused all-head projection in one lane-dense MXU pass (bf16 in, f32 accumulate).
    wh_all = jnp.dot(x2d.astype(jnp.bfloat16), w_all,
                     preferred_element_type=jnp.float32)                 # (BN, H*F) f32

    out_acc = jnp.zeros((BN, F), jnp.float32)
    for h in range(n_heads):                       # H=4, static unroll -> chains interleave
        wh2d = wh_all[:, h * F:(h + 1) * F]                              # (BN, F) static slice
        wh = wh2d.reshape(B, N, F)                                       # (B, N, F) f32

        # Pearson correlation between node rows (over the feature axis):
        # center, row-normalize with rsqrt (EUP), then one batched MXU contraction.
        hc = wh - jnp.mean(wh, axis=-1, keepdims=True)                   # (B, N, F) f32
        ssq = jnp.sum(hc * hc, axis=-1, keepdims=True)                   # (B, N, 1)
        hc_n = (hc * lax.rsqrt(ssq + 1e-12)).astype(jnp.bfloat16)        # bf16 at MXU boundary
        corr = lax.dot_general(hc_n, hc_n,
                               (((2,), (2,)), ((0,), (0,))),
                               preferred_element_type=jnp.float32)       # (B, N, N) f32

        # Row-wise softmax in f32 (denominator reciprocal on the EUP).
        m = jnp.max(corr, axis=-1, keepdims=True)
        e = jnp.exp(corr - m)
        attn = e * pl.reciprocal(jnp.sum(e, axis=-1, keepdims=True), approx=True)

        # Head aggregate: (B,N,N) @ (B,N,F) -> (B,N,F), bf16 operands / f32 accumulate.
        head = lax.dot_general(attn.astype(jnp.bfloat16), wh.astype(jnp.bfloat16),
                               (((2,), (1,)), ((0,), (0,))),
                               preferred_element_type=jnp.float32)       # (B, N, F) f32

        # Fold the head-concat into the fc: accumulate head_h @ W_fc^T[h*F:(h+1)*F].
        # (No XLU lane concat; each per-head fc issues as soon as the head is ready.)
        out_acc = out_acc + jnp.dot(head.reshape(BN, F).astype(jnp.bfloat16),
                                    w_fc_t[h * F:(h + 1) * F, :],
                                    preferred_element_type=jnp.float32)  # (BN, F) f32

    o_ref[...] = out_acc.reshape(B, N, F).astype(o_ref.dtype)
    # TODO(synk): output minor dim is 32 lanes (masked vst). Negligible at 2 KB total;
    # present a lane-dense slab if F / N ever scale.


def prepare_weights(w_heads, w_fc):
    """One-time (model-init) weight layout plumbing — keep OFF the per-call path.

    w_heads: (H, F, F) with Wh = x @ w_heads[h];  w_fc: (F, H*F) PyTorch nn.Linear layout.
    Returns (w_all, w_fc_t) in bf16:
      w_all[:, h*F:(h+1)*F] == w_heads[h]   -> fused projection weight (F, H*F)
      w_fc_t == w_fc.T                      -> fc applied without in-kernel transpose
    """
    H, F, _ = w_heads.shape
    w_all = jnp.transpose(w_heads, (1, 0, 2)).reshape(F, H * F).astype(jnp.bfloat16)
    w_fc_t = jnp.transpose(w_fc).astype(jnp.bfloat16)                    # (H*F, F)
    return w_all, w_fc_t


def multi_head_attention(x, w_all, w_fc_t):
    """x: (B, N, F) f32; w_all: (F, H*F) bf16; w_fc_t: (H*F, F) bf16 (from prepare_weights)."""
    B, N, F = x.shape
    H = w_all.shape[1] // F

    kernel = functools.partial(_mha_kernel, n_heads=H, feature_dim=F)

    # grid=() — one invocation, everything VMEM-resident (no per-step grid/DMA overhead).
    return pl.pallas_call(
        kernel,
        out_shape=jax.ShapeDtypeStruct((B, N, F), jnp.float32),
        in_specs=[
            pl.BlockSpec(memory_space=pltpu.MemorySpace.VMEM),           # x
            pl.BlockSpec(memory_space=pltpu.MemorySpace.VMEM),           # W_all (bf16)
            pl.BlockSpec(memory_space=pltpu.MemorySpace.VMEM),           # W_fc^T (bf16)
        ],
        out_specs=pl.BlockSpec(memory_space=pltpu.MemorySpace.VMEM),
    )(x, w_all, w_fc_t)


def _reference(x, w_heads, w_fc):
    """Pure-JAX f32 reference matching the PyTorch module semantics (eval mode)."""
    heads = []
    for h in range(w_heads.shape[0]):
        wh = x @ w_heads[h]                                              # (B, N, F)
        hc = wh - jnp.mean(wh, axis=-1, keepdims=True)
        cov = jnp.einsum("bnf,bmf->bnm", hc, hc)
        ssq = jnp.sum(hc * hc, axis=-1, keepdims=True)
        corr = cov / jnp.sqrt(ssq * jnp.swapaxes(ssq, -1, -2))
        attn = jax.nn.softmax(corr, axis=-1)
        heads.append(jnp.einsum("bnm,bmf->bnf", attn, wh))
    multi = jnp.concatenate(heads, axis=-1)                              # (B, N, H*F)
    return multi @ w_fc.T


if __name__ == "__main__":
    B, N, F, H = 2, 8, 32, 4   # batch, node_size, feature_dim, n_heads

    key = jax.random.PRNGKey(0)
    kx, kw, kf = jax.random.split(key, 3)
    x = jax.random.normal(kx, (B, N, F), dtype=jnp.float32)
    # Deterministic synthetic parameters (xavier-ish scale).
    w_heads = jax.random.normal(kw, (H, F, F), dtype=jnp.float32) * (1.0 / jnp.sqrt(F))
    w_fc = jax.random.normal(kf, (F, H * F), dtype=jnp.float32) * (1.0 / jnp.sqrt(H * F))

    # One-time weight prep (model-init cost, not per-forward).
    w_all, w_fc_t = prepare_weights(w_heads, w_fc)

    out = multi_head_attention(x, w_all, w_fc_t)
    out = jax.block_until_ready(out)

    ref = _reference(x, w_heads, w_fc)
    assert out.shape == (B, N, F)
    # Tolerance accounts for bf16 MXU operands + pl.reciprocal(approx=True) vs f32 reference.
    assert jnp.allclose(out, ref, atol=5e-2, rtol=5e-2), "kernel mismatch vs reference"

    print("KERNEL_OK")
</pallas_src>

<mosaic_0001>
module attributes {stable_mosaic.version = 11 : i64} {
  func.func @_mha_kernel(%arg0: memref<2x8x32xf32, #tpu.memory_space<vmem>>, %arg1: memref<32x128xbf16, #tpu.memory_space<vmem>>, %arg2: memref<128x32xbf16, #tpu.memory_space<vmem>>, %arg3: memref<2x8x32xf32, #tpu.memory_space<vmem>>) attributes {dimension_semantics = [], scalar_prefetch = 0 : i64, scratch_operands = 0 : i64, tpu.core_type = #tpu.core_type<tc>} {
    %c0 = arith.constant 0 : index
    %c0_0 = arith.constant 0 : index
    %0 = vector.load %arg1[%c0, %c0_0] : memref<32x128xbf16, #tpu.memory_space<vmem>>, vector<32x128xbf16>
    %c0_1 = arith.constant 0 : index
    %c0_2 = arith.constant 0 : index
    %1 = vector.load %arg2[%c0_1, %c0_2] : memref<128x32xbf16, #tpu.memory_space<vmem>>, vector<128x32xbf16>
    %c0_3 = arith.constant 0 : index
    %c0_4 = arith.constant 0 : index
    %c0_5 = arith.constant 0 : index
    %2 = vector.load %arg0[%c0_3, %c0_4, %c0_5] : memref<2x8x32xf32, #tpu.memory_space<vmem>>, vector<2x8x32xf32>
    %3 = vector.shape_cast %2 : vector<2x8x32xf32> to vector<16x32xf32>
    %4 = arith.truncf %3 : vector<16x32xf32> to vector<16x32xbf16>
    %cst = arith.constant dense<0.000000e+00> : vector<16x128xf32>
    %5 = tpu.matmul %4, %0, %cst {dimension_numbers = #tpu.dot_dimension_numbers<[1], [0], [0], [1], [0, 0, 1, 1], [], []>} : vector<16x32xbf16>, vector<32x128xbf16>, vector<16x128xf32> -> vector<16x128xf32>
    %cst_6 = arith.constant 0.000000e+00 : f32
    %6 = vector.broadcast %cst_6 : f32 to vector<16x32xf32>
    %7 = vector.extract_strided_slice %5 {offsets = [0, 0], sizes = [16, 32], strides = [1, 1]} : vector<16x128xf32> to vector<16x32xf32>
    %8 = vector.shape_cast %7 : vector<16x32xf32> to vector<2x8x32xf32>
    %cst_7 = arith.constant dense<0.000000e+00> : vector<2x8xf32>
    %9 = vector.multi_reduction <add>, %8, %cst_7 [2] : vector<2x8x32xf32> to vector<2x8xf32>
    %10 = vector.shape_cast %9 : vector<2x8xf32> to vector<2x8x1xf32>
    %cst_8 = arith.constant 3.200000e+01 : f32
    %11 = vector.broadcast %cst_8 : f32 to vector<2x8x1xf32>
    %12 = arith.divf %10, %11 : vector<2x8x1xf32>
    %13 = vector.broadcast %12 : vector<2x8x1xf32> to vector<2x8x32xf32>
    %14 = arith.subf %8, %13 : vector<2x8x32xf32>
    %15 = arith.mulf %14, %14 : vector<2x8x32xf32>
    %cst_9 = arith.constant dense<0.000000e+00> : vector<2x8xf32>
    %16 = vector.multi_reduction <add>, %15, %cst_9 [2] : vector<2x8x32xf32> to vector<2x8xf32>
    %17 = vector.shape_cast %16 : vector<2x8xf32> to vector<2x8x1xf32>
    %cst_10 = arith.constant 9.99999996E-13 : f32
    %18 = vector.broadcast %cst_10 : f32 to vector<2x8x1xf32>
    %19 = arith.addf %17, %18 : vector<2x8x1xf32>
    %20 = math.rsqrt %19 : vector<2x8x1xf32>
    %21 = vector.broadcast %20 : vector<2x8x1xf32> to vector<2x8x32xf32>
    %22 = arith.mulf %14, %21 : vector<2x8x32xf32>
    %23 = arith.truncf %22 : vector<2x8x32xf32> to vector<2x8x32xbf16>
    %cst_11 = arith.constant dense<0.000000e+00> : vector<2x8x8xf32>
    %24 = tpu.matmul %23, %23, %cst_11 {dimension_numbers = #tpu.dot_dimension_numbers<[2], [2], [1], [1], [0, 0, 0, 1, 1, 1], [0], [0]>} : vector<2x8x32xbf16>, vector<2x8x32xbf16>, vector<2x8x8xf32> -> vector<2x8x8xf32>
    %cst_12 = arith.constant dense<0xFF800000> : vector<2x8xf32>
    %25 = vector.multi_reduction <maximumf>, %24, %cst_12 [2] : vector<2x8x8xf32> to vector<2x8xf32>
    %26 = vector.shape_cast %25 : vector<2x8xf32> to vector<2x8x1xf32>
    %27 = vector.broadcast %26 : vector<2x8x1xf32> to vector<2x8x8xf32>
    %28 = arith.subf %24, %27 : vector<2x8x8xf32>
    %29 = math.exp %28 : vector<2x8x8xf32>
    %cst_13 = arith.constant dense<0.000000e+00> : vector<2x8xf32>
    %30 = vector.multi_reduction <add>, %29, %cst_13 [2] : vector<2x8x8xf32> to vector<2x8xf32>
    %31 = vector.shape_cast %30 : vector<2x8xf32> to vector<2x8x1xf32>
    %32 = tpu.reciprocal %31 {approx = true} : vector<2x8x1xf32> -> vector<2x8x1xf32>
    %33 = vector.broadcast %32 : vector<2x8x1xf32> to vector<2x8x8xf32>
    %34 = arith.mulf %29, %33 : vector<2x8x8xf32>
    %35 = arith.truncf %34 : vector<2x8x8xf32> to vector<2x8x8xbf16>
    %36 = arith.truncf %8 : vector<2x8x32xf32> to vector<2x8x32xbf16>
    %cst_14 = arith.constant dense<0.000000e+00> : vector<2x8x32xf32>
    %37 = tpu.matmul %35, %36, %cst_14 {dimension_numbers = #tpu.dot_dimension_numbers<[2], [1], [1], [2], [0, 0, 0, 1, 1, 2], [0], [0]>} : vector<2x8x8xbf16>, vector<2x8x32xbf16>, vector<2x8x32xf32> -> vector<2x8x32xf32>
    %38 = vector.shape_cast %37 : vector<2x8x32xf32> to vector<16x32xf32>
    %39 = arith.truncf %38 : vector<16x32xf32> to vector<16x32xbf16>
    %40 = vector.extract_strided_slice %1 {offsets = [0, 0], sizes = [32, 32], strides = [1, 1]} : vector<128x32xbf16> to vector<32x32xbf16>
    %cst_15 = arith.constant dense<0.000000e+00> : vector<16x32xf32>
    %41 = tpu.matmul %39, %40, %cst_15 {dimension_numbers = #tpu.dot_dimension_numbers<[1], [0], [0], [1], [0, 0, 1, 1], [], []>} : vector<16x32xbf16>, vector<32x32xbf16>, vector<16x32xf32> -> vector<16x32xf32>
    %42 = arith.addf %6, %41 : vector<16x32xf32>
    %43 = vector.extract_strided_slice %5 {offsets = [0, 32], sizes = [16, 32], strides = [1, 1]} : vector<16x128xf32> to vector<16x32xf32>
    %44 = vector.shape_cast %43 : vector<16x32xf32> to vector<2x8x32xf32>
    %cst_16 = arith.constant dense<0.000000e+00> : vector<2x8xf32>
    %45 = vector.multi_reduction <add>, %44, %cst_16 [2] : vector<2x8x32xf32> to vector<2x8xf32>
    %46 = vector.shape_cast %45 : vector<2x8xf32> to vector<2x8x1xf32>
    %cst_17 = arith.constant 3.200000e+01 : f32
    %47 = vector.broadcast %cst_17 : f32 to vector<2x8x1xf32>
    %48 = arith.divf %46, %47 : vector<2x8x1xf32>
    %49 = vector.broadcast %48 : vector<2x8x1xf32> to vector<2x8x32xf32>
    %50 = arith.subf %44, %49 : vector<2x8x32xf32>
    %51 = arith.mulf %50, %50 : vector<2x8x32xf32>
    %cst_18 = arith.constant dense<0.000000e+00> : vector<2x8xf32>
    %52 = vector.multi_reduction <add>, %51, %cst_18 [2] : vector<2x8x32xf32> to vector<2x8xf32>
    %53 = vector.shape_cast %52 : vector<2x8xf32> to vector<2x8x1xf32>
    %cst_19 = arith.constant 9.99999996E-13 : f32
    %54 = vector.broadcast %cst_19 : f32 to vector<2x8x1xf32>
    %55 = arith.addf %53, %54 : vector<2x8x1xf32>
    %56 = math.rsqrt %55 : vector<2x8x1xf32>
    %57 = vector.broadcast %56 : vector<2x8x1xf32> to vector<2x8x32xf32>
    %58 = arith.mulf %50, %57 : vector<2x8x32xf32>
    %59 = arith.truncf %58 : vector<2x8x32xf32> to vector<2x8x32xbf16>
    %cst_20 = arith.constant dense<0.000000e+00> : vector<2x8x8xf32>
    %60 = tpu.matmul %59, %59, %cst_20 {dimension_numbers = #tpu.dot_dimension_numbers<[2], [2], [1], [1], [0, 0, 0, 1, 1, 1], [0], [0]>} : vector<2x8x32xbf16>, vector<2x8x32xbf16>, vector<2x8x8xf32> -> vector<2x8x8xf32>
    %cst_21 = arith.constant dense<0xFF800000> : vector<2x8xf32>
    %61 = vector.multi_reduction <maximumf>, %60, %cst_21 [2] : vector<2x8x8xf32> to vector<2x8xf32>
    %62 = vector.shape_cast %61 : vector<2x8xf32> to vector<2x8x1xf32>
    %63 = vector.broadcast %62 : vector<2x8x1xf32> to vector<2x8x8xf32>
    %64 = arith.subf %60, %63 : vector<2x8x8xf32>
    %65 = math.exp %64 : vector<2x8x8xf32>
    %cst_22 = arith.constant dense<0.000000e+00> : vector<2x8xf32>
    %66 = vector.multi_reduction <add>, %65, %cst_22 [2] : vector<2x8x8xf32> to vector<2x8xf32>
    %67 = vector.shape_cast %66 : vector<2x8xf32> to vector<2x8x1xf32>
    %68 = tpu.reciprocal %67 {approx = true} : vector<2x8x1xf32> -> vector<2x8x1xf32>
    %69 = vector.broadcast %68 : vector<2x8x1xf32> to vector<2x8x8xf32>
    %70 = arith.mulf %65, %69 : vector<2x8x8xf32>
    %71 = arith.truncf %70 : vector<2x8x8xf32> to vector<2x8x8xbf16>
    %72 = arith.truncf %44 : vector<2x8x32xf32> to vector<2x8x32xbf16>
    %cst_23 = arith.constant dense<0.000000e+00> : vector<2x8x32xf32>
    %73 = tpu.matmul %71, %72, %cst_23 {dimension_numbers = #tpu.dot_dimension_numbers<[2], [1], [1], [2], [0, 0, 0, 1, 1, 2], [0], [0]>} : vector<2x8x8xbf16>, vector<2x8x32xbf16>, vector<2x8x32xf32> -> vector<2x8x32xf32>
    %74 = vector.shape_cast %73 : vector<2x8x32xf32> to vector<16x32xf32>
    %75 = arith.truncf %74 : vector<16x32xf32> to vector<16x32xbf16>
    %76 = vector.extract_strided_slice %1 {offsets = [32, 0], sizes = [32, 32], strides = [1, 1]} : vector<128x32xbf16> to vector<32x32xbf16>
    %cst_24 = arith.constant dense<0.000000e+00> : vector<16x32xf32>
    %77 = tpu.matmul %75, %76, %cst_24 {dimension_numbers = #tpu.dot_dimension_numbers<[1], [0], [0], [1], [0, 0, 1, 1], [], []>} : vector<16x32xbf16>, vector<32x32xbf16>, vector<16x32xf32> -> vector<16x32xf32>
    %78 = arith.addf %42, %77 : vector<16x32xf32>
    %79 = vector.extract_strided_slice %5 {offsets = [0, 64], sizes = [16, 32], strides = [1, 1]} : vector<16x128xf32> to vector<16x32xf32>
    %80 = vector.shape_cast %79 : vector<16x32xf32> to vector<2x8x32xf32>
    %cst_25 = arith.constant dense<0.000000e+00> : vector<2x8xf32>
    %81 = vector.multi_reduction <add>, %80, %cst_25 [2] : vector<2x8x32xf32> to vector<2x8xf32>
    %82 = vector.shape_cast %81 : vector<2x8xf32> to vector<2x8x1xf32>
    %cst_26 = arith.constant 3.200000e+01 : f32
    %83 = vector.broadcast %cst_26 : f32 to vector<2x8x1xf32>
    %84 = arith.divf %82, %83 : vector<2x8x1xf32>
    %85 = vector.broadcast %84 : vector<2x8x1xf32> to vector<2x8x32xf32>
    %86 = arith.subf %80, %85 : vector<2x8x32xf32>
    %87 = arith.mulf %86, %86 : vector<2x8x32xf32>
    %cst_27 = arith.constant dense<0.000000e+00> : vector<2x8xf32>
    %88 = vector.multi_reduction <add>, %87, %cst_27 [2] : vector<2x8x32xf32> to vector<2x8xf32>
    %89 = vector.shape_cast %88 : vector<2x8xf32> to vector<2x8x1xf32>
    %cst_28 = arith.constant 9.99999996E-13 : f32
    %90 = vector.broadcast %cst_28 : f32 to vector<2x8x1xf32>
    %91 = arith.addf %89, %90 : vector<2x8x1xf32>
    %92 = math.rsqrt %91 : vector<2x8x1xf32>
    %93 = vector.broadcast %92 : vector<2x8x1xf32> to vector<2x8x32xf32>
    %94 = arith.mulf %86, %93 : vector<2x8x32xf32>
    %95 = arith.truncf %94 : vector<2x8x32xf32> to vector<2x8x32xbf16>
    %cst_29 = arith.constant dense<0.000000e+00> : vector<2x8x8xf32>
    %96 = tpu.matmul %95, %95, %cst_29 {dimension_numbers = #tpu.dot_dimension_numbers<[2], [2], [1], [1], [0, 0, 0, 1, 1, 1], [0], [0]>} : vector<2x8x32xbf16>, vector<2x8x32xbf16>, vector<2x8x8xf32> -> vector<2x8x8xf32>
    %cst_30 = arith.constant dense<0xFF800000> : vector<2x8xf32>
    %97 = vector.multi_reduction <maximumf>, %96, %cst_30 [2] : vector<2x8x8xf32> to vector<2x8xf32>
    %98 = vector.shape_cast %97 : vector<2x8xf32> to vector<2x8x1xf32>
    %99 = vector.broadcast %98 : vector<2x8x1xf32> to vector<2x8x8xf32>
    %100 = arith.subf %96, %99 : vector<2x8x8xf32>
    %101 = math.exp %100 : vector<2x8x8xf32>
    %cst_31 = arith.constant dense<0.000000e+00> : vector<2x8xf32>
    %102 = vector.multi_reduction <add>, %101, %cst_31 [2] : vector<2x8x8xf32> to vector<2x8xf32>
    %103 = vector.shape_cast %102 : vector<2x8xf32> to vector<2x8x1xf32>
    %104 = tpu.reciprocal %103 {approx = true} : vector<2x8x1xf32> -> vector<2x8x1xf32>
    %105 = vector.broadcast %104 : vector<2x8x1xf32> to vector<2x8x8xf32>
    %106 = arith.mulf %101, %105 : vector<2x8x8xf32>
    %107 = arith.truncf %106 : vector<2x8x8xf32> to vector<2x8x8xbf16>
    %108 = arith.truncf %80 : vector<2x8x32xf32> to vector<2x8x32xbf16>
    %cst_32 = arith.constant dense<0.000000e+00> : vector<2x8x32xf32>
    %109 = tpu.matmul %107, %108, %cst_32 {dimension_numbers = #tpu.dot_dimension_numbers<[2], [1], [1], [2], [0, 0, 0, 1, 1, 2], [0], [0]>} : vector<2x8x8xbf16>, vector<2x8x32xbf16>, vector<2x8x32xf32> -> vector<2x8x32xf32>
    %110 = vector.shape_cast %109 : vector<2x8x32xf32> to vector<16x32xf32>
    %111 = arith.truncf %110 : vector<16x32xf32> to vector<16x32xbf16>
    %112 = vector.extract_strided_slice %1 {offsets = [64, 0], sizes = [32, 32], strides = [1, 1]} : vector<128x32xbf16> to vector<32x32xbf16>
    %cst_33 = arith.constant dense<0.000000e+00> : vector<16x32xf32>
    %113 = tpu.matmul %111, %112, %cst_33 {dimension_numbers = #tpu.dot_dimension_numbers<[1], [0], [0], [1], [0, 0, 1, 1], [], []>} : vector<16x32xbf16>, vector<32x32xbf16>, vector<16x32xf32> -> vector<16x32xf32>
    %114 = arith.addf %78, %113 : vector<16x32xf32>
    %115 = vector.extract_strided_slice %5 {offsets = [0, 96], sizes = [16, 32], strides = [1, 1]} : vector<16x128xf32> to vector<16x32xf32>
    %116 = vector.shape_cast %115 : vector<16x32xf32> to vector<2x8x32xf32>
    %cst_34 = arith.constant dense<0.000000e+00> : vector<2x8xf32>
    %117 = vector.multi_reduction <add>, %116, %cst_34 [2] : vector<2x8x32xf32> to vector<2x8xf32>
    %118 = vector.shape_cast %117 : vector<2x8xf32> to vector<2x8x1xf32>
    %cst_35 = arith.constant 3.200000e+01 : f32
    %119 = vector.broadcast %cst_35 : f32 to vector<2x8x1xf32>
    %120 = arith.divf %118, %119 : vector<2x8x1xf32>
    %121 = vector.broadcast %120 : vector<2x8x1xf32> to vector<2x8x32xf32>
    %122 = arith.subf %116, %121 : vector<2x8x32xf32>
    %123 = arith.mulf %122, %122 : vector<2x8x32xf32>
    %cst_36 = arith.constant dense<0.000000e+00> : vector<2x8xf32>
    %124 = vector.multi_reduction <add>, %123, %cst_36 [2] : vector<2x8x32xf32> to vector<2x8xf32>
    %125 = vector.shape_cast %124 : vector<2x8xf32> to vector<2x8x1xf32>
    %cst_37 = arith.constant 9.99999996E-13 : f32
    %126 = vector.broadcast %cst_37 : f32 to vector<2x8x1xf32>
    %127 = arith.addf %125, %126 : vector<2x8x1xf32>
    %128 = math.rsqrt %127 : vector<2x8x1xf32>
    %129 = vector.broadcast %128 : vector<2x8x1xf32> to vector<2x8x32xf32>
    %130 = arith.mulf %122, %129 : vector<2x8x32xf32>
    %131 = arith.truncf %130 : vector<2x8x32xf32> to vector<2x8x32xbf16>
    %cst_38 = arith.constant dense<0.000000e+00> : vector<2x8x8xf32>
    %132 = tpu.matmul %131, %131, %cst_38 {dimension_numbers = #tpu.dot_dimension_numbers<[2], [2], [1], [1], [0, 0, 0, 1, 1, 1], [0], [0]>} : vector<2x8x32xbf16>, vector<2x8x32xbf16>, vector<2x8x8xf32> -> vector<2x8x8xf32>
    %cst_39 = arith.constant dense<0xFF800000> : vector<2x8xf32>
    %133 = vector.multi_reduction <maximumf>, %132, %cst_39 [2] : vector<2x8x8xf32> to vector<2x8xf32>
    %134 = vector.shape_cast %133 : vector<2x8xf32> to vector<2x8x1xf32>
    %135 = vector.broadcast %134 : vector<2x8x1xf32> to vector<2x8x8xf32>
    %136 = arith.subf %132, %135 : vector<2x8x8xf32>
    %137 = math.exp %136 : vector<2x8x8xf32>
    %cst_40 = arith.constant dense<0.000000e+00> : vector<2x8xf32>
    %138 = vector.multi_reduction <add>, %137, %cst_40 [2] : vector<2x8x8xf32> to vector<2x8xf32>
    %139 = vector.shape_cast %138 : vector<2x8xf32> to vector<2x8x1xf32>
    %140 = tpu.reciprocal %139 {approx = true} : vector<2x8x1xf32> -> vector<2x8x1xf32>
    %141 = vector.broadcast %140 : vector<2x8x1xf32> to vector<2x8x8xf32>
    %142 = arith.mulf %137, %141 : vector<2x8x8xf32>
    %143 = arith.truncf %142 : vector<2x8x8xf32> to vector<2x8x8xbf16>
    %144 = arith.truncf %116 : vector<2x8x32xf32> to vector<2x8x32xbf16>
    %cst_41 = arith.constant dense<0.000000e+00> : vector<2x8x32xf32>
    %145 = tpu.matmul %143, %144, %cst_41 {dimension_numbers = #tpu.dot_dimension_numbers<[2], [1], [1], [2], [0, 0, 0, 1, 1, 2], [0], [0]>} : vector<2x8x8xbf16>, vector<2x8x32xbf16>, vector<2x8x32xf32> -> vector<2x8x32xf32>
    %146 = vector.shape_cast %145 : vector<2x8x32xf32> to vector<16x32xf32>
    %147 = arith.truncf %146 : vector<16x32xf32> to vector<16x32xbf16>
    %148 = vector.extract_strided_slice %1 {offsets = [96, 0], sizes = [32, 32], strides = [1, 1]} : vector<128x32xbf16> to vector<32x32xbf16>
    %cst_42 = arith.constant dense<0.000000e+00> : vector<16x32xf32>
    %149 = tpu.matmul %147, %148, %cst_42 {dimension_numbers = #tpu.dot_dimension_numbers<[1], [0], [0], [1], [0, 0, 1, 1], [], []>} : vector<16x32xbf16>, vector<32x32xbf16>, vector<16x32xf32> -> vector<16x32xf32>
    %150 = arith.addf %114, %149 : vector<16x32xf32>
    %151 = vector.shape_cast %150 : vector<16x32xf32> to vector<2x8x32xf32>
    %c0_43 = arith.constant 0 : index
    %c0_44 = arith.constant 0 : index
    %c0_45 = arith.constant 0 : index
    %152 = vector.load %arg3[%c0_43, %c0_44, %c0_45] : memref<2x8x32xf32, #tpu.memory_space<vmem>>, vector<2x8x32xf32>
    tpu.vector_store %arg3[%c0_43, %c0_44, %c0_45], %151 {strides = array<i32>} : memref<2x8x32xf32, #tpu.memory_space<vmem>>, vector<2x8x32xf32>,
    return
  }
}

</mosaic_0001>

<bundles_post_ra>
// kernel: tpu_custom_call.1
= control target key start
LH: loop header
LB: loop body
LE: loop exit
PB: predicated region body
PF: predicated region fallthrough
CT: control target
= control target key end

     0   :  { %s1273_s0 = inlined_call_operand.vmem [shape: f32[2,8,32], index: 0, kind: input, shape index: {}]   ;;  %s1274_s1 = inlined_call_operand.vmem [shape: bf16[32,128], index: 1, kind: input, shape index: {}]   ;;  %s1275_s2 = inlined_call_operand.vmem [shape: bf16[128,32], index: 2, kind: input, shape index: {}]   ;;  %s1276_s3 = inlined_call_operand.hbm [shape: f32[2,8,32], index: 3, kind: output, shape index: {}]  }
   0x1   :  { %v930_v0 = vld [vmem:[%s1274_s1 + $0x8] sm:$0xff] }
   0x2   :  { %8 = vsyncpa [#allocation3], 0  ;;  %61 = vmatpush.bf16.msra.mxu0 %v930_v0  ;;  %v929_v1 = vld [vmem:[%s1274_s1] sm:$0xff]  ;;  %v37_v3 = vld [vmem:[%s1273_s0 + $0x8] sm:$0xff]  ;;  %vm51_vm0 = vcmask 261120   ;;  %vm182_vm1 = vcmask 1043456  }
   0x3   :  { %v36_v2 = vld [vmem:[%s1273_s0] sm:$0xff]  ;;  %s1022_s20 = smov 96   ;;  %v1023_v13 = vmov 32.0   ;;  %s1024_s0 = smov 64   ;;  %vm152_vm15 = vcmask 64512  }
   0x4   :  { %v38_v4 = vpack.c.bf16 %v37_v3, %v36_v2  ;;  %946 = vrcp.f32 %v1023_v13  ;;  %s1025_s1 = smov 32   ;;  %s1026_s10 = smov [#allocation2]  }
   0x5   :  { %s854_s11 = sshll.u32 %s1026_s10, 4  ;;  %s1027_s14 = smov 128   ;;  %s855_s11 = int_to_ptr.vmem [resolvable:$true] %s854_s11 }
   0x6   :  { %62 = vmatpush.bf16.msra.mxu0 %v929_v1  ;;  %s1028_s15 = smov 8  }
   0x9   :  { %876 = vmatmul.msk.bf16.vlgmr.msra.gmra.mxu0 %vm51_vm0, %v38_v4 }
   0xa   :  { %v947_v14 = vpop.eup %946 }
   0xb   :  { %v76_v15 = vmul.f32 32.0, %v947_v14  ;;  %vm80_vm2 = vweird.f32 %v947_v14 }
   0xd   :  { %v77_v16 = vsub.f32 1.0, %v76_v15 }
   0xf   :  { %v78_v17 = vmul.f32 %v947_v14, %v77_v16 }
  0x11   :  { %v79_v18 = vadd.f32 %v947_v14, %v78_v17 }
  0x13   :  { %v1081_v19 = vsel %vm80_vm2, %v947_v14, %v79_v18 }
  0x86   :  { %v1062_v5 = vpop.f32.mrf.mxu0 }
  0x87   :  { %221 = vrot.lane.b32.xlu0 %v1062_v5, %s1022_s20  ;;  %v1068_v6 = vpack.c.bf16 %v1062_v5, %v1062_v5  ;;  %v69_v28 = vsel %vm51_vm0, %v1062_v5, 0.0 }
  0x89   :  { %v184_v7 = vsel %vm182_vm1, %v1068_v6, 0 }
  0x8a   :  { %193 = vmatpush.bf16.msra.mxu3 %v184_v7 }
  0x8e   :  { %v1072_v8 = vpop.f32.mrf.mxu0 }
  0x8f   :  { %v1076_v9 = vpack.c.bf16 %v1072_v8, %v1072_v8  ;;  %v72_v29 = vsel %vm51_vm0, %v1072_v8, 0.0 }
  0x91   :  { %v203_v10 = vsel %vm182_vm1, %v1076_v9, 0 }
  0x92   :  { %212 = vmatpush.bf16.msrb.mxu3 %v203_v10 }
  0xf9   :  { %v222_v11 = vpop.permute.xlu0 %221 }
  0xfa   :  { %v227_v12 = vsel %vm51_vm0, %v222_v11, 0.0 }
  0xfb   :  { %228 = vadd.xlane.f32.xlu0 %v227_v12 }
 0x16e   :  { %v229_v20 = vpop.xlane.xlu0 %228 }
 0x16f   :  { %v233_v21 = vmul.f32 %v229_v20, %v1081_v19 }
 0x171   :  { %v235_v22 = vsub.f32 %v1062_v5, %v233_v21 }
 0x173   :  { %v237_v23 = vmul.f32 %v235_v22, %v235_v22 }
 0x175   :  { %241 = vrot.lane.b32.xlu1 %v237_v23, %s1022_s20 }
 0x17d   :  { %223 = vrot.lane.b32.xlu1 %v1072_v8, %s1022_s20 }
 0x1e7   :  { %v242_v24 = vpop.permute.xlu1 %241 }
 0x1e8   :  { %v247_v25 = vsel %vm51_vm0, %v242_v24, 0.0 }
 0x1e9   :  { %248 = vadd.xlane.f32.xlu2 %v247_v25 }
 0x1ef   :  { %v224_v26 = vpop.permute.xlu1 %223 }
 0x1f0   :  { %v230_v27 = vsel %vm51_vm0, %v224_v26, 0.0 }
 0x1f1   :  { %231 = vadd.xlane.f32.xlu2 %v230_v27 }
 0x1f9   :  { %70 = vadd.xlane.f32.xlu2 %v69_v28 }
 0x201   :  { %73 = vadd.xlane.f32.xlu2 %v72_v29 }
 0x25c   :  { %v249_v30 = vpop.xlane.xlu2 %248 }
 0x25d   :  { %v253_v31 = vadd.f32 1e-12, %v249_v30 }
 0x25f   :  { %948 = vrsqrt.f32 %v253_v31  ;;  %vm261_vm4 = vweird.f32 %v253_v31 }
 0x264   :  { %v232_v32 = vpop.xlane.xlu2 %231 }
 0x265   :  { %v949_v33 = vpop.eup %948  ;;  %v234_v34 = vmul.f32 %v232_v32, %v1081_v19 }
 0x266   :  { %v256_v35 = vmul.f32 %v949_v33, %v253_v31  ;;  %vm262_vm3 = vweird.f32 %v949_v33 }
 0x267   :  { %v1096_v36 = vsub.f32 %v1072_v8, %v234_v34  ;;  %vm263_vm5 = vmor %vm261_vm4, %vm262_vm3 }
 0x268   :  { %v257_v37 = vmul.f32 %v949_v33, %v256_v35 }
 0x269   :  { %v238_v38 = vmul.f32 %v1096_v36, %v1096_v36 }
 0x26a   :  { %v258_v39 = vmul.f32 0.5, %v257_v37 }
 0x26b   :  { %243 = vrot.lane.b32.xlu1 %v238_v38, %s1022_s20 }
 0x26c   :  { %v259_v40 = vsub.f32 1.5, %v258_v39  ;;  %v71_v41 = vpop.xlane.xlu2 %70 }
 0x26d   :  { %v82_v42 = vmul.f32 %v1081_v19, %v71_v41 }
 0x26e   :  { %v260_v43 = vmul.f32 %v949_v33, %v259_v40 }
 0x26f   :  { %v84_v44 = vsub.f32 %v1062_v5, %v82_v42 }
 0x270   :  { %v264_v45 = vsel %vm263_vm5, %v949_v33, %v260_v43 }
 0x271   :  { %v86_v46 = vmul.f32 %v84_v44, %v84_v44  ;;  %v275_v47 = vmul.f32 %v264_v45, %v235_v22 }
 0x273   :  { %v88_v48 = vsel %vm51_vm0, %v86_v46, 0.0  ;;  %v277_v49 = vpack.c.bf16 %v275_v47, %v275_v47 }
 0x274   :  { %89 = vadd.xlane.f32.xlu2 %v88_v48  ;;  %v74_v50 = vpop.xlane.xlu2 %73 }
 0x275   :  { %v83_v51 = vmul.f32 %v1081_v19, %v74_v50  ;;  %v280_v52 = vunpack.c.l.b16 %v277_v49 }
 0x277   :  { %v85_v53 = vsub.f32 %v1072_v8, %v83_v51  ;;  %v281_v54 = vpack.c.b16 %v280_v52, %v280_v52 }
 0x279   :  { %282 = vrot.lane.b32.xlu1 %v281_v54, %s1022_s20  ;;  %v87_v55 = vmul.f32 %v85_v53, %v85_v53 }
 0x27b   :  { %v91_v56 = vsel %vm51_vm0, %v87_v55, 0.0 }
 0x27c   :  { %92 = vadd.xlane.f32.xlu0 %v91_v56 }
 0x28c   :  { %452 = vrot.lane.b32.xlu2 %v1062_v5, %s1024_s0 }
 0x2dd   :  { %v244_v57 = vpop.permute.xlu1 %243 }
 0x2de   :  { %v250_v58 = vsel %vm51_vm0, %v244_v57, 0.0 }
 0x2df   :  { %251 = vadd.xlane.f32.xlu1 %v250_v58  ;;  %v346_v58 = vunpack.c.l.b16 %v1068_v6 }
 0x2e7   :  { %v90_v59 = vpop.xlane.xlu2 %89 }
 0x2e8   :  { %v94_v60 = vadd.f32 1e-12, %v90_v59 }
 0x2ea   :  { %950 = vrsqrt.f32 %v94_v60  ;;  %vm102_vm7 = vweird.f32 %v94_v60 }
 0x2eb   :  { %v283_v61 = vpop.permute.xlu1 %282 }
 0x2ec   :  { %v285_v62 = vsel %vm51_vm0, %v283_v61, 0 }
 0x2ed   :  { %294 = vmatpush.bf16.xpose.msrb.mxu0 %v285_v62 }
 0x2ef   :  { %v93_v63 = vpop.xlane.xlu0 %92  ;;  %v453_v0 = vpop.permute.xlu2 %452 }
 0x2f0   :  { %v951_v1 = vpop.eup %950  ;;  %v95_v2 = vadd.f32 1e-12, %v93_v63  ;;  %v458_v3 = vsel %vm51_vm0, %v453_v0, 0.0  ;;  %v1138_v63 = vpack.c.b16 %v346_v58, %v346_v58 }
 0x2f1   :  { %v97_v4 = vmul.f32 %v951_v1, %v94_v60  ;;  %459 = vadd.xlane.f32.xlu0 %v458_v3  ;;  %vm103_vm6 = vweird.f32 %v951_v1 }
 0x2f2   :  { %952 = vrsqrt.f32 %v95_v2  ;;  %vm104_vm8 = vmor %vm102_vm7, %vm103_vm6  ;;  %vm112_vm10 = vweird.f32 %v95_v2 }
 0x2f3   :  { %v98_v7 = vmul.f32 %v951_v1, %v97_v4 }
 0x2f4   :  { %881 = vmatmul.msk.bf16.vlgmr.msrb.gmra.mxu0 %vm51_vm0, %v283_v61 }
 0x2f5   :  { %v99_v10 = vmul.f32 0.5, %v98_v7 }
 0x2f7   :  { %v100_v11 = vsub.f32 1.5, %v99_v10 }
 0x2f8   :  { %v953_v12 = vpop.eup %952 }
 0x2f9   :  { %v107_v13 = vmul.f32 %v953_v12, %v95_v2  ;;  %v101_v14 = vmul.f32 %v951_v1, %v100_v11  ;;  %vm113_vm9 = vweird.f32 %v953_v12 }
 0x2fa   :  { %vm114_vm11 = vmor %vm112_vm10, %vm113_vm9 }
 0x2fb   :  { %v108_v15 = vmul.f32 %v953_v12, %v107_v13  ;;  %v105_v16 = vsel %vm104_vm8, %v951_v1, %v101_v14 }
 0x2fc   :  { %v116_v17 = vmul.f32 %v105_v16, %v84_v44 }
 0x2fd   :  { %v109_v18 = vmul.f32 0.5, %v108_v15 }
 0x2fe   :  { %v118_v20 = vpack.c.bf16 %v116_v17, %v116_v17 }
 0x2ff   :  { %v110_v21 = vsub.f32 1.5, %v109_v18 }
 0x300   :  { %v121_v22 = vsel %vm51_vm0, %v118_v20, 0 }
 0x301   :  { %130 = vmatpush.bf16.xpose.msra.mxu1 %v121_v22  ;;  %v111_v23 = vmul.f32 %v953_v12, %v110_v21 }
 0x303   :  { %v115_v24 = vsel %vm114_vm11, %v953_v12, %v111_v23 }
 0x304   :  { %v117_v25 = vmul.f32 %v115_v24, %v85_v53 }
 0x306   :  { %v119_v26 = vpack.c.bf16 %v117_v25, %v117_v25 }
 0x308   :  { %877 = vmatmul.msk.bf16.vlgmr.msra.gmra.mxu1 %vm51_vm0, %v118_v20  ;;  %v137_v27 = vsel %vm51_vm0, %v119_v26, 0 }
 0x309   :  { %146 = vmatpush.bf16.xpose.msra.mxu2 %v137_v27 }
 0x310   :  { %878 = vmatmul.msk.bf16.vlgmr.msra.gmra.mxu2 %vm51_vm0, %v119_v26 }
 0x352   :  { %v252_v28 = vpop.xlane.xlu1 %251 }
 0x353   :  { %v254_v29 = vadd.f32 1e-12, %v252_v28 }
 0x355   :  { %954 = vrsqrt.f32 %v254_v29  ;;  %vm271_vm13 = vweird.f32 %v254_v29 }
 0x35b   :  { %v955_v30 = vpop.eup %954 }
 0x35c   :  { %v266_v31 = vmul.f32 %v955_v30, %v254_v29  ;;  %vm272_vm12 = vweird.f32 %v955_v30 }
 0x35d   :  { %vm273_vm14 = vmor %vm271_vm13, %vm272_vm12 }
 0x35e   :  { %v267_v32 = vmul.f32 %v955_v30, %v266_v31 }
 0x360   :  { %v268_v33 = vmul.f32 0.5, %v267_v32 }
 0x362   :  { %v269_v34 = vsub.f32 1.5, %v268_v33 }
 0x364   :  { %v270_v35 = vmul.f32 %v955_v30, %v269_v34  ;;  %v460_v37 = vpop.xlane.xlu0 %459 }
 0x365   :  { %v464_v38 = vmul.f32 %v460_v37, %v1081_v19 }
 0x366   :  { %v274_v39 = vsel %vm273_vm14, %v955_v30, %v270_v35 }
 0x367   :  { %v1120_v40 = vsub.f32 %v1062_v5, %v464_v38  ;;  %v276_v41 = vmul.f32 %v274_v39, %v1096_v36 }
 0x369   :  { %v468_v42 = vmul.f32 %v1120_v40, %v1120_v40  ;;  %v278_v43 = vpack.c.bf16 %v276_v41, %v276_v41 }
 0x36b   :  { %472 = vrot.lane.b32.xlu0 %v468_v42, %s1024_s0  ;;  %v301_v44 = vunpack.c.l.b16 %v278_v43 }
 0x36d   :  { %v302_v45 = vpack.c.b16 %v301_v44, %v301_v44 }
 0x36f   :  { %303 = vrot.lane.b32.xlu2 %v302_v45, %s1022_s20 }
 0x371   :  { %v296_v46 = vpop.f32.mrf.mxu0 }
 0x372   :  { %v321_v47 = vsel %vm152_vm15, %v296_v46, -inf }
 0x373   :  { %322 = vmax.xlane.f32.xlu1 %v321_v47 }
 0x377   :  { %454 = vrot.lane.b32.xlu2 %v1072_v8, %s1024_s0 }
 0x379   :  { %v298_v48 = vpop.f32.mrf.mxu0 }
 0x385   :  { %v132_v36 = vpop.f32.mrf.mxu1 }
 0x386   :  { %v153_v60 = vsel %vm152_vm15, %v132_v36, -inf }
 0x38d   :  { %v134_v49 = vpop.f32.mrf.mxu1 }
 0x393   :  { %v1130_v50 = vpop.f32.mrf.mxu2 }
 0x394   :  { %v156_v2 = vsel %vm152_vm15, %v1130_v50, -inf }
 0x39b   :  { %v150_v51 = vpop.f32.mrf.mxu2 }
 0x3c9   :  { %v304_v52 = vpop.permute.xlu2 %303 }
 0x3ca   :  { %v306_v53 = vsel %vm51_vm0, %v304_v52, 0 }
 0x3cb   :  { %315 = vmatpush.bf16.xpose.msrb.mxu1 %v306_v53 }
 0x3d1   :  { %v455_v54 = vpop.permute.xlu2 %454 }
 0x3d2   :  { %882 = vmatmul.msk.bf16.vlgmr.msrb.gmra.mxu1 %vm51_vm0, %v304_v52  ;;  %v461_v55 = vsel %vm51_vm0, %v455_v54, 0.0 }
 0x3d3   :  { %462 = vadd.xlane.f32.xlu1 %v461_v55 }
 0x3dd   :  { %v473_v56 = vpop.permute.xlu0 %472 }
 0x3de   :  { %v478_v57 = vsel %vm51_vm0, %v473_v56, 0.0 }
 0x3df   :  { %479 = vadd.xlane.f32.xlu2 %v478_v57 }
 0x3e6   :  { %v323_v59 = vpop.xlane.xlu1 %322 }
 0x3e7   :  { %v327_v61 = vsub.f32 %v296_v46, %v323_v59  ;;  %154 = vmax.xlane.f32.xlu2 %v153_v60 }
 0x3e9   :  { %v329_v62 = vmul.f32 1.442695, %v327_v61 }
 0x3eb   :  { %956 = vpow2.f32 %v329_v62 }
 0x3ec   :  { %348 = vrot.lane.b32.xlu1 %v1138_v63, %s1022_s20 }
 0x3f1   :  { %v957_v0 = vpop.eup %956 }
 0x3f2   :  { %v333_v1 = vsel %vm152_vm15, %v957_v0, 0.0 }
 0x3f3   :  { %334 = vadd.xlane.f32.xlu0 %v333_v1 }
 0x3fb   :  { %157 = vmax.xlane.f32.xlu0 %v156_v2 }
 0x446   :  { %v463_v6 = vpop.xlane.xlu1 %462 }
 0x447   :  { %v465_v3 = vmul.f32 %v463_v6, %v1081_v19 }
 0x449   :  { %v1147_v4 = vsub.f32 %v1072_v8, %v465_v3 }
 0x44b   :  { %v469_v7 = vmul.f32 %v1147_v4, %v1147_v4 }
 0x44d   :  { %474 = vrot.lane.b32.xlu1 %v469_v7, %s1024_s0 }
 0x44f   :  { %v317_v10 = vpop.f32.mrf.mxu1 }
 0x450   :  { %v324_v11 = vsel %vm152_vm15, %v317_v10, -inf }
 0x451   :  { %325 = vmax.xlane.f32.xlu2 %v324_v11 }
 0x452   :  { %v480_v12 = vpop.xlane.xlu2 %479 }
 0x453   :  { %v484_v13 = vadd.f32 1e-12, %v480_v12 }
 0x455   :  { %958 = vrsqrt.f32 %v484_v13  ;;  %vm492_vm3 = vweird.f32 %v484_v13 }
 0x457   :  { %v319_v14 = vpop.f32.mrf.mxu1 }
 0x45a   :  { %v155_v15 = vpop.xlane.xlu2 %154 }
 0x45b   :  { %v959_v16 = vpop.eup %958  ;;  %v159_v17 = vsub.f32 %v132_v36, %v155_v15 }
 0x45c   :  { %v487_v18 = vmul.f32 %v959_v16, %v484_v13  ;;  %vm493_vm2 = vweird.f32 %v959_v16 }
 0x45d   :  { %v161_v20 = vmul.f32 1.442695, %v159_v17  ;;  %vm494_vm4 = vmor %vm492_vm3, %vm493_vm2 }
 0x45e   :  { %v488_v21 = vmul.f32 %v959_v16, %v487_v18  ;;  %v349_v22 = vpop.permute.xlu1 %348 }
 0x45f   :  { %960 = vpow2.f32 %v161_v20  ;;  %v354_v23 = vsel %vm182_vm1, %v349_v22, 0 }
 0x460   :  { %v489_v24 = vmul.f32 0.5, %v488_v21  ;;  %363 = vmatpush.bf16.msrb.mxu2 %v354_v23 }
 0x462   :  { %v490_v25 = vsub.f32 1.5, %v489_v24 }
 0x464   :  { %v491_v26 = vmul.f32 %v959_v16, %v490_v25 }
 0x465   :  { %v961_v27 = vpop.eup %960 }
 0x466   :  { %v335_v28 = vpop.xlane.xlu0 %334  ;;  %v165_v29 = vsel %vm152_vm15, %v961_v27, 0.0  ;;  %v495_v30 = vsel %vm494_vm4, %v959_v16, %v491_v26 }
 0x467   :  { %962 = vrcp.f32 %v335_v28  ;;  %166 = vadd.xlane.f32.xlu0 %v165_v29  ;;  %v506_v31 = vmul.f32 %v495_v30, %v1120_v40  ;;  %v932_v28 = vld [vmem:[%s1275_s2 + $0x8] sm:$0xff] }
 0x468   :  { %444 = vmatpush.bf16.msra.mxu1 %v932_v28 }
 0x469   :  { %650 = vrot.lane.b32.xlu2 %v1062_v5, %s1025_s1  ;;  %v508_v32 = vpack.c.bf16 %v506_v31, %v506_v31 }
 0x46b   :  { %v511_v33 = vunpack.c.l.b16 %v508_v32 }
 0x46d   :  { %v963_v34 = vpop.eup %962  ;;  %v512_v35 = vpack.c.b16 %v511_v33, %v511_v33 }
 0x46e   :  { %v341_v37 = vmul.f32 %v963_v34, %v957_v0  ;;  %v158_v39 = vpop.xlane.xlu0 %157 }
 0x46f   :  { %513 = vrot.lane.b32.xlu1 %v512_v35, %s1024_s0  ;;  %v160_v40 = vsub.f32 %v1130_v50, %v158_v39  ;;  %v370_v50 = vunpack.c.l.b16 %v1076_v9  ;;  %v931_v35 = vld [vmem:[%s1275_s2] sm:$0xff] }
 0x470   :  { %v343_v38 = vpack.c.bf16 %v341_v37, %v341_v37  ;;  %445 = vmatpush.bf16.msra.mxu1 %v931_v35 }
 0x471   :  { %v163_v41 = vmul.f32 1.442695, %v160_v40  ;;  %v1167_v51 = vpack.c.b16 %v370_v50, %v370_v50 }
 0x472   :  { %883 = vmatmul.msk.bf16.vlgmr.msrb.gmra.mxu2 %vm152_vm15, %v343_v38 }
 0x473   :  { %964 = vpow2.f32 %v163_v41 }
 0x479   :  { %v965_v42 = vpop.eup %964 }
 0x47a   :  { %v168_v43 = vsel %vm152_vm15, %v965_v42, 0.0 }
 0x47b   :  { %652 = vrot.lane.b32.xlu0 %v1072_v8, %s1025_s1 }
 0x492   :  { %169 = vadd.xlane.f32.xlu2 %v168_v43 }
 0x4bf   :  { %v475_v44 = vpop.permute.xlu1 %474 }
 0x4c0   :  { %v481_v45 = vsel %vm51_vm0, %v475_v44, 0.0 }
 0x4c1   :  { %482 = vadd.xlane.f32.xlu1 %v481_v45 }
 0x4c4   :  { %v326_v46 = vpop.xlane.xlu2 %325 }
 0x4c5   :  { %v328_v47 = vsub.f32 %v317_v10, %v326_v46 }
 0x4c7   :  { %v331_v48 = vmul.f32 1.442695, %v328_v47 }
 0x4c9   :  { %966 = vpow2.f32 %v331_v48 }
 0x4cc   :  { %v651_v60 = vpop.permute.xlu2 %650 }
 0x4cd   :  { %v656_v62 = vsel %vm51_vm0, %v651_v60, 0.0 }
 0x4cf   :  { %v967_v36 = vpop.eup %966 }
 0x4d0   :  { %v336_v49 = vsel %vm152_vm15, %v967_v36, 0.0 }
 0x4d1   :  { %337 = vadd.xlane.f32.xlu0 %v336_v49 }
 0x4da   :  { %372 = vrot.lane.b32.xlu1 %v1167_v51, %s1022_s20  ;;  %v167_v52 = vpop.xlane.xlu0 %166 }
 0x4db   :  { %968 = vrcp.f32 %v167_v52 }
 0x4e1   :  { %v969_v53 = vpop.eup %968  ;;  %v514_v54 = vpop.permute.xlu1 %513 }
 0x4e2   :  { %v516_v55 = vsel %vm51_vm0, %v514_v54, 0  ;;  %v173_v56 = vmul.f32 %v969_v53, %v961_v27 }
 0x4e3   :  { %525 = vmatpush.bf16.xpose.msra.mxu2 %v516_v55 }
 0x4e4   :  { %v175_v57 = vpack.c.bf16 %v173_v56, %v173_v56 }
 0x4e6   :  { %879 = vmatmul.msk.bf16.vlgmr.msra.gmra.mxu3 %vm152_vm15, %v175_v57 }
 0x4ea   :  { %903 = vmatmul.msk.bf16.vlgmr.msra.gmra.mxu2 %vm51_vm0, %v514_v54 }
 0x4ed   :  { %v653_v58 = vpop.permute.xlu0 %652 }
 0x4ee   :  { %v659_v9 = vsel %vm51_vm0, %v653_v58, 0.0 }
 0x4ef   :  { %660 = vadd.xlane.f32.xlu2 %v659_v9 }
 0x4f5   :  { %v1175_v59 = vpop.f32.mrf.mxu2 }
 0x4fd   :  { %v367_v61 = vpop.f32.mrf.mxu2 }
 0x504   :  { %657 = vadd.xlane.f32.xlu1 %v656_v62 }
 0x505   :  { %v170_v0 = vpop.xlane.xlu2 %169 }
 0x506   :  { %970 = vrcp.f32 %v170_v0 }
 0x50c   :  { %v971_v1 = vpop.eup %970 }
 0x50d   :  { %v174_v2 = vmul.f32 %v971_v1, %v965_v42 }
 0x50f   :  { %v176_v6 = vpack.c.bf16 %v174_v2, %v174_v2 }
 0x511   :  { %880 = vmatmul.msk.bf16.vlgmr.msrb.gmra.mxu3 %vm152_vm15, %v176_v6 }
 0x534   :  { %v483_v3 = vpop.xlane.xlu1 %482 }
 0x535   :  { %v485_v7 = vadd.f32 1e-12, %v483_v3 }
 0x537   :  { %972 = vrsqrt.f32 %v485_v7  ;;  %vm502_vm6 = vweird.f32 %v485_v7 }
 0x53d   :  { %v973_v10 = vpop.eup %972 }
 0x53e   :  { %v497_v11 = vmul.f32 %v973_v10, %v485_v7  ;;  %vm503_vm5 = vweird.f32 %v973_v10 }
 0x53f   :  { %vm504_vm7 = vmor %vm502_vm6, %vm503_vm5 }
 0x540   :  { %v498_v12 = vmul.f32 %v973_v10, %v497_v11 }
 0x542   :  { %v499_v13 = vmul.f32 0.5, %v498_v12 }
 0x544   :  { %v500_v14 = vsub.f32 1.5, %v499_v13  ;;  %v338_v15 = vpop.xlane.xlu0 %337 }
 0x545   :  { %974 = vrcp.f32 %v338_v15 }
 0x546   :  { %v501_v16 = vmul.f32 %v973_v10, %v500_v14 }
 0x548   :  { %v505_v17 = vsel %vm504_vm7, %v973_v10, %v501_v16 }
 0x549   :  { %v507_v18 = vmul.f32 %v505_v17, %v1147_v4 }
 0x54b   :  { %v975_v20 = vpop.eup %974  ;;  %v509_v21 = vpack.c.bf16 %v507_v18, %v507_v18 }
 0x54c   :  { %v342_v22 = vmul.f32 %v975_v20, %v967_v36  ;;  %v373_v23 = vpop.permute.xlu1 %372 }
 0x54d   :  { %v378_v24 = vsel %vm182_vm1, %v373_v23, 0  ;;  %v532_v25 = vunpack.c.l.b16 %v509_v21 }
 0x54e   :  { %v344_v26 = vpack.c.bf16 %v342_v22, %v342_v22  ;;  %387 = vmatpush.bf16.msra.mxu3 %v378_v24 }
 0x54f   :  { %v533_v27 = vpack.c.b16 %v532_v25, %v532_v25 }
 0x551   :  { %534 = vrot.lane.b32.xlu0 %v533_v27, %s1024_s0  ;;  %884 = vmatmul.msk.bf16.vlgmr.msra.gmra.mxu3 %vm152_vm15, %v344_v26 }
 0x562   :  { %v661_v4 = vpop.xlane.xlu2 %660 }
 0x563   :  { %v663_v29 = vmul.f32 %v661_v4, %v1081_v19 }
 0x565   :  { %v1188_v30 = vsub.f32 %v1072_v8, %v663_v29 }
 0x567   :  { %v667_v31 = vmul.f32 %v1188_v30, %v1188_v30 }
 0x569   :  { %v195_v32 = vpop.f32.mrf.mxu3  ;;  %672 = vrot.lane.b32.xlu0 %v667_v31, %s1025_s1 }
 0x56d   :  { %v527_v33 = vpop.f32.mrf.mxu2 }
 0x56e   :  { %v552_v41 = vsel %vm152_vm15, %v527_v33, -inf }
 0x571   :  { %v197_v34 = vpop.f32.mrf.mxu3 }
 0x575   :  { %v529_v37 = vpop.f32.mrf.mxu2 }
 0x577   :  { %v658_v38 = vpop.xlane.xlu1 %657 }
 0x578   :  { %v662_v39 = vmul.f32 %v658_v38, %v1081_v19  ;;  %v934_v19 = vld [vmem:[%s1275_s2 + $0x18] sm:$0xff] }
 0x579   :  { %415 = vmatpush.bf16.msra.mxu0 %v934_v19 }
 0x57a   :  { %v1198_v8 = vsub.f32 %v1062_v5, %v662_v39  ;;  %v933_v5 = vld [vmem:[%s1275_s2 + $0x10] sm:$0xff] }
 0x57c   :  { %v666_v40 = vmul.f32 %v1198_v8, %v1198_v8 }
 0x57d   :  { %416 = vmatpush.bf16.msra.mxu0 %v933_v5 }
 0x57e   :  { %670 = vrot.lane.b32.xlu2 %v666_v40, %s1025_s1 }
 0x593   :  { %553 = vmax.xlane.f32.xlu0 %v552_v41 }
 0x594   :  { %v214_v42 = vpop.f32.mrf.mxu3 }
 0x595   :  { %v218_v43 = vpack.c.bf16 %v214_v42, %v195_v32 }
 0x597   :  { %902 = vmatmul.msk.bf16.vlgmr.msra.gmra.mxu1 %vm51_vm0, %v218_v43 }
 0x59c   :  { %v216_v44 = vpop.f32.mrf.mxu3 }
 0x5c3   :  { %v535_v45 = vpop.permute.xlu0 %534 }
 0x5c4   :  { %v537_v46 = vsel %vm51_vm0, %v535_v45, 0 }
 0x5c5   :  { %546 = vmatpush.bf16.xpose.msrb.mxu3 %v537_v46 }
 0x5cc   :  { %904 = vmatmul.msk.bf16.vlgmr.msrb.gmra.mxu3 %vm51_vm0, %v535_v45 }
 0x5d4   :  { %v389_v47 = vpop.f32.mrf.mxu3 }
 0x5d5   :  { %v393_v48 = vpack.c.bf16 %v389_v47, %v1175_v59 }
 0x5d7   :  { %893 = vmatmul.msk.bf16.vlgmr.msra.gmra.mxu0 %vm51_vm0, %v393_v48 }
 0x5d8   :  { %v671_v36 = vpop.permute.xlu2 %670 }
 0x5d9   :  { %v676_v49 = vsel %vm51_vm0, %v671_v36, 0.0 }
 0x5da   :  { %677 = vadd.xlane.f32.xlu2 %v676_v49 }
 0x5db   :  { %v673_v50 = vpop.permute.xlu0 %672 }
 0x5dc   :  { %v391_v52 = vpop.f32.mrf.mxu3  ;;  %v679_v53 = vsel %vm51_vm0, %v673_v50, 0.0 }
 0x5dd   :  { %680 = vadd.xlane.f32.xlu1 %v679_v53 }
 0x606   :  { %v554_v54 = vpop.xlane.xlu0 %553 }
 0x607   :  { %v558_v55 = vsub.f32 %v527_v33, %v554_v54 }
 0x609   :  { %v560_v56 = vmul.f32 1.442695, %v558_v55 }
 0x60b   :  { %976 = vpow2.f32 %v560_v56 }
 0x611   :  { %v977_v57 = vpop.eup %976 }
 0x612   :  { %v564_v58 = vsel %vm152_vm15, %v977_v57, 0.0 }
 0x613   :  { %565 = vadd.xlane.f32.xlu1 %v564_v58 }
 0x614   :  { %v447_v0 = vpop.f32.mrf.mxu1 }
 0x62c   :  { %576 = vrot.lane.b32.xlu1 %v1138_v63, %s1024_s0 }
 0x64d   :  { %v678_v9 = vpop.xlane.xlu2 %677 }
 0x64e   :  { %v682_v59 = vadd.f32 1e-12, %v678_v9  ;;  %v936_v9 = vld [vmem:[%s1275_s2 + $0x28] sm:$0xff] }
 0x64f   :  { %v548_v60 = vpop.f32.mrf.mxu3  ;;  %640 = vmatpush.bf16.msrb.mxu2 %v936_v9 }
 0x650   :  { %978 = vrsqrt.f32 %v682_v59  ;;  %v681_v61 = vpop.xlane.xlu1 %680  ;;  %v555_v6 = vsel %vm152_vm15, %v548_v60, -inf  ;;  %vm690_vm9 = vweird.f32 %v682_v59 }
 0x651   :  { %v683_v62 = vadd.f32 1e-12, %v681_v61 }
 0x653   :  { %980 = vrsqrt.f32 %v683_v62  ;;  %vm700_vm12 = vweird.f32 %v683_v62 }
 0x654   :  { %v418_v1 = vpop.f32.mrf.mxu0 }
 0x655   :  { %v1220_v2 = vadd.f32 %v447_v0, %v418_v1  ;;  %v449_v0 = vpop.f32.mrf.mxu1 }
 0x656   :  { %v979_v3 = vpop.eup %978  ;;  %556 = vmax.xlane.f32.xlu1 %v555_v6 }
 0x657   :  { %v685_v7 = vmul.f32 %v979_v3, %v682_v59  ;;  %v550_v10 = vpop.f32.mrf.mxu3  ;;  %vm691_vm8 = vweird.f32 %v979_v3  ;;  %v935_v59 = vld [vmem:[%s1275_s2 + $0x20] sm:$0xff] }
 0x658   :  { %vm692_vm10 = vmor %vm690_vm9, %vm691_vm8  ;;  %641 = vmatpush.bf16.msrb.mxu2 %v935_v59 }
 0x659   :  { %v981_v11 = vpop.eup %980  ;;  %v686_v12 = vmul.f32 %v979_v3, %v685_v7 }
 0x65a   :  { %v695_v13 = vmul.f32 %v981_v11, %v683_v62  ;;  %vm701_vm11 = vweird.f32 %v981_v11 }
 0x65b   :  { %v687_v14 = vmul.f32 0.5, %v686_v12  ;;  %vm702_vm13 = vmor %vm700_vm12, %vm701_vm11 }
 0x65c   :  { %v696_v15 = vmul.f32 %v981_v11, %v695_v13  ;;  %v1237_v46 = vpop.f32.mrf.mxu0 }
 0x65d   :  { %v688_v16 = vsub.f32 1.5, %v687_v14 }
 0x65e   :  { %v697_v17 = vmul.f32 0.5, %v696_v15 }
 0x65f   :  { %v689_v18 = vmul.f32 %v979_v3, %v688_v16 }
 0x660   :  { %v698_v20 = vsub.f32 1.5, %v697_v17 }
 0x661   :  { %v693_v21 = vsel %vm692_vm10, %v979_v3, %v689_v18 }
 0x662   :  { %v699_v22 = vmul.f32 %v981_v11, %v698_v20  ;;  %v704_v23 = vmul.f32 %v693_v21, %v1198_v8 }
 0x664   :  { %v706_v24 = vpack.c.bf16 %v704_v23, %v704_v23  ;;  %v703_v25 = vsel %vm702_vm13, %v981_v11, %v699_v22 }
 0x665   :  { %v705_v26 = vmul.f32 %v703_v25, %v1188_v30 }
 0x666   :  { %v709_v27 = vunpack.c.l.b16 %v706_v24 }
 0x667   :  { %v707_v28 = vpack.c.bf16 %v705_v26, %v705_v26 }
 0x668   :  { %v710_v4 = vpack.c.b16 %v709_v27, %v709_v27 }
 0x669   :  { %v730_v29 = vunpack.c.l.b16 %v707_v28 }
 0x66a   :  { %711 = vrot.lane.b32.xlu2 %v710_v4, %s1025_s1  ;;  %v938_v4 = vld [vmem:[%s1275_s2 + $0x38] sm:$0xff] }
 0x66b   :  { %v731_v31 = vpack.c.b16 %v730_v29, %v730_v29 }
 0x66d   :  { %732 = vrot.lane.b32.xlu0 %v731_v31, %s1025_s1 }
 0x672   :  { %597 = vrot.lane.b32.xlu2 %v1167_v51, %s1024_s0 }
 0x686   :  { %v566_v32 = vpop.xlane.xlu1 %565 }
 0x687   :  { %982 = vrcp.f32 %v566_v32 }
 0x68d   :  { %v983_v33 = vpop.eup %982 }
 0x68e   :  { %v572_v34 = vmul.f32 %v983_v33, %v977_v57 }
 0x690   :  { %v574_v30 = vpack.c.bf16 %v572_v34, %v572_v34 }
 0x69e   :  { %v577_v35 = vpop.permute.xlu1 %576 }
 0x69f   :  { %v582_v37 = vsel %vm182_vm1, %v577_v35, 0 }
 0x6a0   :  { %591 = vmatpush.bf16.msrb.mxu0 %v582_v37 }
 0x6a3   :  { %905 = vmatmul.msk.bf16.vlgmr.msrb.gmra.mxu0 %vm152_vm15, %v574_v30 }
 0x6c4   :  { %v712_v38 = vpop.permute.xlu2 %711 }
 0x6c5   :  { %v714_v39 = vsel %vm51_vm0, %v712_v38, 0 }
 0x6c6   :  { %723 = vmatpush.bf16.xpose.msra.mxu3 %v714_v39 }
 0x6c9   :  { %v557_v8 = vpop.xlane.xlu1 %556 }
 0x6ca   :  { %v559_v40 = vsub.f32 %v548_v60, %v557_v8 }
 0x6cc   :  { %v562_v41 = vmul.f32 1.442695, %v559_v40  ;;  %v598_v42 = vpop.permute.xlu2 %597 }
 0x6cd   :  { %v603_v43 = vsel %vm182_vm1, %v598_v42, 0  ;;  %916 = vmatmul.msk.bf16.vlgmr.msra.gmra.mxu3 %vm51_vm0, %v712_v38  ;;  %v450_v38 = vadd.f32 %v449_v0, %v1237_v46 }
 0x6ce   :  { %984 = vpow2.f32 %v562_v41  ;;  %612 = vmatpush.bf16.msrb.mxu1 %v603_v43  ;;  %838 = vmatpush.bf16.msrb.mxu3 %v938_v4 }
 0x6d4   :  { %v985_v44 = vpop.eup %984 }
 0x6d5   :  { %v567_v19 = vsel %vm152_vm15, %v985_v44, 0.0 }
 0x6d6   :  { %568 = vadd.xlane.f32.xlu0 %v567_v19 }
 0x6df   :  { %v733_v5 = vpop.permute.xlu0 %732 }
 0x6e0   :  { %v735_v45 = vsel %vm51_vm0, %v733_v5, 0 }
 0x6e1   :  { %744 = vmatpush.bf16.xpose.msra.mxu0 %v735_v45 }
 0x6e8   :  { %917 = vmatmul.msk.bf16.vlgmr.msra.gmra.mxu0 %vm51_vm0, %v733_v5 }
 0x720   :  { %v593_v47 = vpop.f32.mrf.mxu0 }
 0x728   :  { %v595_v48 = vpop.f32.mrf.mxu0 }
 0x749   :  { %v569_v36 = vpop.xlane.xlu0 %568 }
 0x74a   :  { %986 = vrcp.f32 %v569_v36 }
 0x750   :  { %v987_v49 = vpop.eup %986  ;;  %v725_v50 = vpop.f32.mrf.mxu3 }
 0x751   :  { %v573_v52 = vmul.f32 %v987_v49, %v985_v44  ;;  %v750_v53 = vsel %vm152_vm15, %v725_v50, -inf }
 0x752   :  { %751 = vmax.xlane.f32.xlu1 %v750_v53 }
 0x753   :  { %v575_v54 = vpack.c.bf16 %v573_v52, %v573_v52 }
 0x755   :  { %906 = vmatmul.msk.bf16.vlgmr.msrb.gmra.mxu1 %vm152_vm15, %v575_v54 }
 0x758   :  { %v727_v55 = vpop.f32.mrf.mxu3 }
 0x765   :  { %v746_v56 = vpop.f32.mrf.mxu0 }
 0x766   :  { %v753_v57 = vsel %vm152_vm15, %v746_v56, -inf }
 0x767   :  { %754 = vmax.xlane.f32.xlu2 %v753_v57 }
 0x76d   :  { %v748_v58 = vpop.f32.mrf.mxu0 }
 0x7c5   :  { %v752_v60 = vpop.xlane.xlu1 %751 }
 0x7c6   :  { %v756_v61 = vsub.f32 %v725_v50, %v752_v60 }
 0x7c8   :  { %v758_v62 = vmul.f32 1.442695, %v756_v61 }
 0x7ca   :  { %988 = vpow2.f32 %v758_v62 }
 0x7d0   :  { %v989_v1 = vpop.eup %988 }
 0x7d1   :  { %v762_v6 = vsel %vm152_vm15, %v989_v1, 0.0 }
 0x7d2   :  { %763 = vadd.xlane.f32.xlu0 %v762_v6  ;;  %v614_v3 = vpop.f32.mrf.mxu1 }
 0x7d3   :  { %v618_v7 = vpack.c.bf16 %v614_v3, %v593_v47 }
 0x7d5   :  { %915 = vmatmul.msk.bf16.vlgmr.msrb.gmra.mxu2 %vm51_vm0, %v618_v7 }
 0x7da   :  { %v616_v10 = vpop.f32.mrf.mxu1  ;;  %v755_v11 = vpop.xlane.xlu2 %754 }
 0x7db   :  { %v757_v12 = vsub.f32 %v746_v56, %v755_v11 }
 0x7dd   :  { %v760_v13 = vmul.f32 1.442695, %v757_v12 }
 0x7df   :  { %990 = vpow2.f32 %v760_v13 }
 0x7e5   :  { %v991_v14 = vpop.eup %990 }
 0x7e6   :  { %774 = vrot.lane.b32.xlu0 %v1138_v63, %s1025_s1  ;;  %v765_v15 = vsel %vm152_vm15, %v991_v14, 0.0 }
 0x7e7   :  { %766 = vadd.xlane.f32.xlu1 %v765_v15 }
 0x800   :  { %795 = vrot.lane.b32.xlu1 %v1167_v51, %s1025_s1 }
 0x845   :  { %v764_v16 = vpop.xlane.xlu0 %763 }
 0x846   :  { %992 = vrcp.f32 %v764_v16 }
 0x84c   :  { %v993_v17 = vpop.eup %992 }
 0x84d   :  { %v770_v18 = vmul.f32 %v993_v17, %v989_v1 }
 0x84f   :  { %v772_v24 = vpack.c.bf16 %v770_v18, %v770_v18 }
 0x858   :  { %v775_v20 = vpop.permute.xlu0 %774  ;;  %v643_v21 = vpop.f32.mrf.mxu2 }
 0x859   :  { %v780_v22 = vsel %vm182_vm1, %v775_v20, 0  ;;  %v648_v23 = vadd.f32 %v643_v21, %v1220_v2  ;;  %v937_v2 = vld [vmem:[%s1275_s2 + $0x30] sm:$0xff]  ;;  %s856_s2 = sshll.u32 %s1276_s3, 4  ;;  %s857_s2 = int_to_ptr.hbm [resolvable:$true] %s856_s2 }
 0x85a   :  { %789 = vmatpush.bf16.msra.mxu1 %v780_v22  ;;  %v767_v63 = vpop.xlane.xlu1 %766  ;;  %839 = vmatpush.bf16.msrb.mxu3 %v937_v2 }
 0x85b   :  { %994 = vrcp.f32 %v767_v63 }
 0x85d   :  { %918 = vmatmul.msk.bf16.vlgmr.msra.gmra.mxu1 %vm152_vm15, %v772_v24 }
 0x860   :  { %v645_v32 = vpop.f32.mrf.mxu2 }
 0x861   :  { %v995_v25 = vpop.eup %994  ;;  %v649_v39 = vadd.f32 %v645_v32, %v450_v38 }
 0x862   :  { %v771_v26 = vmul.f32 %v995_v25, %v991_v14 }
 0x864   :  { %v773_v28 = vpack.c.bf16 %v771_v26, %v771_v26 }
 0x872   :  { %v796_v27 = vpop.permute.xlu1 %795 }
 0x873   :  { %v801_v51 = vsel %vm182_vm1, %v796_v27, 0 }
 0x874   :  { %810 = vmatpush.bf16.msra.mxu2 %v801_v51 }
 0x877   :  { %919 = vmatmul.msk.bf16.vlgmr.msra.gmra.mxu2 %vm152_vm15, %v773_v28 }
 0x8da   :  { %v791_v29 = vpop.f32.mrf.mxu1 }
 0x8e2   :  { %v793_v31 = vpop.f32.mrf.mxu1 }
 0x8fa   :  { %v812_v33 = vpop.f32.mrf.mxu2 }
 0x8fb   :  { %v816_v34 = vpack.c.bf16 %v812_v33, %v791_v29 }
 0x8fd   :  { %928 = vmatmul.msk.bf16.vlgmr.msrb.gmra.mxu3 %vm51_vm0, %v816_v34 }
 0x902   :  { %v814_v35 = vpop.f32.mrf.mxu2 }
 0x980   :  { %v841_v37 = vpop.f32.mrf.mxu3 }
 0x981   :  { %v846_v30 = vadd.f32 %v841_v37, %v648_v23 }
 0x983   :  { %848 = vst.msk [vmem:[#allocation2] sm:$0xff] %vm51_vm0, %v846_v30 }
 0x988   :  { %v843_v8 = vpop.f32.mrf.mxu3 }
 0x989   :  { %v847_v40 = vadd.f32 %v843_v8, %v649_v39 }
 0x98b   :  { %849 = vst.msk [vmem:[#allocation2 + $0x8] sm:$0xff] %vm51_vm0, %v847_v40 }
 0x98c   :  { %862 = dma.vmem_to_hbm [thread:$0]  %s855_s11, 256, %s857_s2, [#allocation3], %s1027_s14, %s1027_s14, %s1028_s15  }
 0x98d   :  { %1020 = dma.done.wait [#allocation3], 256  }
 0x98e   :  { %1021 = vsyncadd [#allocation3], 4294967040 }
 0x98f   :  { %867 = vsyncpa [#allocation3], 1 }

</bundles_post_ra>
